<compile_context>
chip_gen: v7x
topology: tpu7x:2x2x1
jax: 0.10.0
libtpu: 0.0.40
codegen_flags: <defaults>
</compile_context>

<pallas_src>
import functools

import jax
import jax.numpy as jnp
from jax.experimental import pallas as pl
from jax.experimental.pallas import tpu as pltpu

_LANE = 128


def _cdiv(a, b):
    return -(-a // b)


def _round_up(x, m):
    return ((x + m - 1) // m) * m


# ----------------------------- Pallas kernel ------------------------------ #
def _make_pairwise_kernel(P, R, NR, nbr, ragged):
    """Grid = (n_blocks,) over the flattened-pixel (lane) axis.

    Inputs  pin_ref/ptg_ref : [P*R, nbr] f32 blocks.  Sub-row layout: patch p,
                              sub-row c holds lanes [c*NR, (c+1)*NR) of patch p
                              (R in {1, 2}; R=2 only for P=4 / split=2).
    Outputs gsub_ref        : [P*R, P*R] f32 accumulated A_sub @ A_sub.T.
            esub_ref        : [P*R, P]   f32 accumulated exp column sums.
    Both outputs stay VMEM-resident across the single "arbitrary" grid axis.
    """
    PR = P * R

    def kernel(pin_ref, ptg_ref, gsub_ref, esub_ref):
        k = pl.program_id(0)

        @pl.when(k == 0)
        def _init():
            gsub_ref[...] = jnp.zeros_like(gsub_ref)
            esub_ref[...] = jnp.zeros_like(esub_ref)

        pin = pin_ref[...]                       # [PR, nbr] f32
        ptg = ptg_ref[...]

        if ragged:
            # Ragged last block: lanes >= NR hold garbage (no host-side pad).
            # Zeroing them makes the Gram contribution exact; the exp path
            # then over-counts exactly exp(0)=1 per masked lane, which is
            # subtracted analytically in the wrapper (bias = blocks*nbr - NR).
            lane = jax.lax.broadcasted_iota(jnp.int32, (PR, nbr), 1)
            valid = (k * nbr + lane) < NR
            pin = jnp.where(valid, pin, 0.0)
            ptg = jnp.where(valid, ptg, 0.0)

        # map_input path: Gram accumulation on the MXU (NT matmul).  If the
        # Mosaic dump ever shows an explicit per-step RHS transpose on the
        # XLU, switch to pl.dot(pin, pin, trans_b=True); either way the XLU
        # has slack here (EUP is the binding unit).
        gsub_ref[...] += jax.lax.dot_general(
            pin, pin, (((1,), (1,)), ((), ())),
            preferred_element_type=jnp.float32)

        # map_target path: irreducible O(P^2 * N) exp work (VPU + EUP).
        # Column sums are built in registers and committed with ONE
        # lane-dense [PR, P] add per grid step.
        if R == 2:
            is_even = (jax.lax.broadcasted_iota(jnp.int32, (PR, nbr), 0) % 2) == 0
        cols = []
        for b in range(P):
            if R == 1:
                ref = ptg[b:b + 1, :]                        # sublane broadcast
            else:
                # Period-2 sublane tile of patch b's two sub-rows, built from
                # two cheap broadcasts + one select (keeps work on the VPU,
                # which has slack; avoids sublane concat/relayout traffic).
                r0 = jnp.broadcast_to(ptg[2 * b:2 * b + 1, :], (PR, nbr))
                r1 = jnp.broadcast_to(ptg[2 * b + 1:2 * b + 2, :], (PR, nbr))
                ref = jnp.where(is_even, r0, r1)
            d = ref - ptg                                    # [PR, nbr]
            e = jnp.exp(-(d * d))                            # EUP
            cols.append(jnp.sum(e, axis=-1, keepdims=True))  # XLU reduce
        esub_ref[...] += jnp.concatenate(cols, axis=1)       # [PR, P], one add

    return kernel


def _pairwise_maps(pin, ptg, *, max_block_lanes=None):
    """pin/ptg: [P, N] f32 -> (map_input, map_target), each [P, P] f32.

    map_input[a, b]  = mean_n (pin[b, n] - pin[a, n])**2
    map_target[a, b] = mean_n exp(-(ptg[b, n] - ptg[a, n])**2)
    """
    P, N = pin.shape

    # Sublane-density re-tiling (free, row-major preserving): for split=2
    # (P=4) view each patch's N lanes as 2 sub-rows of N/2 lanes so the hot
    # exp path works on fully populated [8, nbr] vregs instead of half-padded
    # [4, nbr].  For P >= 8 the [P, N] layout is already dense.
    R = 2 if (P == 4 and N % 2 == 0) else 1
    PR, NR = P * R, N // R
    pin_s = pin.reshape(PR, NR)      # same memory layout; no data movement
    ptg_s = ptg.reshape(PR, NR)

    # Lane-block sizing: as large as a conservative pipelined-input budget
    # allows (2 arrays x 2 buffers x PR x nbr x 4 B <= ~12 MiB) so realistic
    # problems run in one or a few grid steps.  Fits every generation's
    # physical VMEM (v7x: 64 MiB) under the explicit 40 MiB limit below.
    budget = 12 * 1024 * 1024
    max_nbr = max(_LANE, (budget // (16 * PR)) // _LANE * _LANE)
    if max_block_lanes is not None:
        max_nbr = max(_LANE, min(max_nbr, (max_block_lanes // _LANE) * _LANE))

    if NR <= max_nbr:
        nbr, n_blocks, ragged = NR, 1, False      # one exact full-width block
    else:
        n_blocks = _cdiv(NR, max_nbr)
        nbr = _round_up(_cdiv(NR, n_blocks), _LANE)
        n_blocks = _cdiv(NR, nbr)
        ragged = (n_blocks * nbr != NR)

    kernel = _make_pairwise_kernel(P, R, NR, nbr, ragged)

    cost = pl.CostEstimate(
        flops=int(2 * PR * PR * NR + 5 * P * P * N),
        transcendentals=int(P * P * N),
        bytes_accessed=int(2 * PR * NR * 4 + (PR * PR + PR * P) * 4))

    gsub, esub = pl.pallas_call(
        kernel,
        out_shape=(jax.ShapeDtypeStruct((PR, PR), jnp.float32),
                   jax.ShapeDtypeStruct((PR, P), jnp.float32)),
        grid=(n_blocks,),
        in_specs=[pl.BlockSpec((PR, nbr), lambda k: (0, k)),
                  pl.BlockSpec((PR, nbr), lambda k: (0, k))],
        out_specs=(pl.BlockSpec((PR, PR), lambda k: (0, 0)),
                   pl.BlockSpec((PR, P), lambda k: (0, 0))),
        compiler_params=pltpu.CompilerParams(
            dimension_semantics=("arbitrary",),     # lane axis is a reduction
            vmem_limit_bytes=40 * 1024 * 1024),
        cost_estimate=cost,
    )(pin_s, ptg_s)

    # Tiny O(P^2) finalization in plain JAX: fold sub-rows, expand the Gram
    # matrix to squared distances, correct the ragged exp bias, scale by 1/N.
    if R == 1:
        G, E = gsub, esub
    else:
        G = sum(gsub[c::R, c::R] for c in range(R))          # [P, P]
        E = sum(esub[c::R, :] for c in range(R))             # [P, P]
    sq = jnp.diagonal(G)                                      # ||patch_a||^2
    # Clamp: the quadratic form can go slightly negative from f32 cancellation,
    # unlike the direct-difference formulation.
    map_input = jnp.maximum(sq[:, None] + sq[None, :] - 2.0 * G, 0.0) / float(N)
    bias = float(R * (n_blocks * nbr - NR)) if ragged else 0.0
    map_target = (E - bias) / float(N)
    return map_input, map_target


# ------------------------------- JAX glue --------------------------------- #
def _bilinear_interp_nchw(x, out_h, out_w):
    """F.interpolate(mode='bilinear', align_corners=False), no antialias."""
    B, C, H, W = x.shape
    xf = x.astype(jnp.float32)

    def idx(out, inp):
        o = jnp.arange(out, dtype=jnp.float32)
        src = (o + 0.5) * (float(inp) / float(out)) - 0.5
        src = jnp.maximum(src, 0.0)
        i0 = jnp.minimum(jnp.floor(src).astype(jnp.int32), inp - 1)
        i1 = jnp.minimum(i0 + 1, inp - 1)
        lam = src - i0.astype(jnp.float32)
        return i0, i1, lam

    h0, h1, lh = idx(out_h, H)
    w0, w1, lw = idx(out_w, W)

    top = xf[:, :, h0, :]
    bot = xf[:, :, h1, :]
    rows = top * (1.0 - lh)[None, None, :, None] + bot * lh[None, None, :, None]
    left = rows[:, :, :, w0]
    right = rows[:, :, :, w1]
    return left * (1.0 - lw)[None, None, None, :] + right * lw[None, None, None, :]


def _resample(x, split):
    H, W = x.shape[-2], x.shape[-1]
    h = int((H / split) / 10)
    w = int((W / split) / 10)
    return _bilinear_interp_nchw(x, h * split, w * split), h, w


def _patchify(x, split, h, w):
    B, C = x.shape[0], x.shape[1]
    x = x.reshape(B, C, split, h, split, w)
    x = jnp.transpose(x, (2, 4, 0, 1, 3, 5))          # [S, S, B, C, h, w]
    return x.reshape(split * split, B * C * h * w)    # [P, N]


def _filter_and_reduce(map_input, map_target, *, alpha, split, filter):
    P = split * split
    k = split - filter
    if k > 0:
        # TODO(synk): row-wise sort/zeroing is a tiny PxP op with no Pallas
        # sort primitive; done in plain JAX (matches torch.sort + zeroing;
        # tie-breaking may differ from torch only on exactly equal entries).
        order = jnp.argsort(map_target, axis=1)          # ascending
        mask = jnp.ones((P, P), jnp.float32)
        mask = mask.at[jnp.arange(P)[:, None], order[:, :k]].set(0.0)
        map_target = map_target * mask
    return jnp.mean(map_input * map_target) * alpha


def patch_manifold_loss(inputs, targets, *, alpha, split, filter):
    targets_r, h, w = _resample(targets, split)
    inputs_r, h, w = _resample(inputs, split)

    pin = _patchify(inputs_r, split, h, w).astype(jnp.float32)
    ptg = _patchify(targets_r, split, h, w).astype(jnp.float32)

    map_input, map_target = _pairwise_maps(pin, ptg)     # Pallas hot path
    return _filter_and_reduce(map_input, map_target,
                              alpha=alpha, split=split, filter=filter)


def patch_manifold_loss_reference(inputs, targets, *, alpha, split, filter):
    """Pure-JAX reference of the same math (validation only)."""
    targets_r, h, w = _resample(targets, split)
    inputs_r, h, w = _resample(inputs, split)
    pin = _patchify(inputs_r, split, h, w).astype(jnp.float32)
    ptg = _patchify(targets_r, split, h, w).astype(jnp.float32)

    din = pin[None, :, :] - pin[:, None, :]              # [P, P, N]
    mi = jnp.mean(din * din, axis=-1)
    dtg = ptg[None, :, :] - ptg[:, None, :]
    mt = jnp.mean(jnp.exp(-(dtg * dtg)), axis=-1)
    return _filter_and_reduce(mi, mt, alpha=alpha, split=split, filter=filter)


# --------------------------------- main ----------------------------------- #
if __name__ == "__main__":
    # Module "parameters" (deterministic, from __init__ signature):
    ALPHA, SPLIT, FILTER = 0.5, 2, 1

    key = jax.random.PRNGKey(0)
    k1, k2 = jax.random.split(key)
    # Spatial size must be >= split*10 for a non-degenerate resample
    # (h = int(H/split/10)).  160x160 -> 16x16 resample, 8x8 patches,
    # N = B*C*h*w = 2*4*64 = 512 -> one exact 256-lane sub-row block.
    B, C, H, W = 2, 4, 160, 160
    inputs = jax.random.normal(k1, (B, C, H, W), dtype=jnp.float32)
    targets = jax.random.normal(k2, (B, C, H, W), dtype=jnp.float32)

    loss_fn = jax.jit(functools.partial(
        patch_manifold_loss, alpha=ALPHA, split=SPLIT, filter=FILTER))
    loss = jax.block_until_ready(loss_fn(inputs, targets))
    assert bool(jnp.isfinite(loss)), "loss is not finite"

    # Validate the Pallas hot path against the pure-JAX reference.
    ref = jax.block_until_ready(patch_manifold_loss_reference(
        inputs, targets, alpha=ALPHA, split=SPLIT, filter=FILTER))
    assert bool(jnp.allclose(loss, ref, rtol=1e-2, atol=1e-4)), (
        f"kernel loss {float(loss)} != reference {float(ref)}")

    # Also exercise the multi-block + ragged-mask path of the kernel directly
    # (NR = 389 -> four 128-lane blocks, last one masked in-kernel).
    kp, kq = jax.random.split(jax.random.PRNGKey(1))
    P_t, N_t = 4, 778
    a = jax.random.normal(kp, (P_t, N_t), dtype=jnp.float32)
    b = jax.random.normal(kq, (P_t, N_t), dtype=jnp.float32)
    mi_k, mt_k = _pairwise_maps(a, b, max_block_lanes=128)
    mi_k, mt_k = jax.block_until_ready((mi_k, mt_k))
    di = a[None, :, :] - a[:, None, :]
    mi_r = jnp.mean(di * di, axis=-1)
    dt = b[None, :, :] - b[:, None, :]
    mt_r = jnp.mean(jnp.exp(-(dt * dt)), axis=-1)
    assert bool(jnp.allclose(mi_k, mi_r, rtol=5e-3, atol=1e-4)), "ragged mi mismatch"
    assert bool(jnp.allclose(mt_k, mt_r, rtol=5e-3, atol=1e-4)), "ragged mt mismatch"

    print("KERNEL_OK")
</pallas_src>

<mosaic_0001>
module attributes {stable_mosaic.version = 11 : i64} {
  func.func @kernel(%arg0: i32, %arg1: memref<8x256xf32, #tpu.memory_space<vmem>>, %arg2: memref<8x256xf32, #tpu.memory_space<vmem>>, %arg3: memref<8x8xf32, #tpu.memory_space<vmem>>, %arg4: memref<8x4xf32, #tpu.memory_space<vmem>>) attributes {dimension_semantics = [#tpu.dimension_semantics<arbitrary>], iteration_bounds = array<i64: 1>, scalar_prefetch = 0 : i64, scratch_operands = 0 : i64, tpu.core_type = #tpu.core_type<tc>, window_params = [{transform_indices = @transform_0, window_bounds = array<i64: 8, 256>}, {transform_indices = @transform_1, window_bounds = array<i64: 8, 256>}, {pipeline_mode = #tpu.pipeline_mode<synchronous>, transform_indices = @transform_2, window_bounds = array<i64: 8, 8>}, {pipeline_mode = #tpu.pipeline_mode<synchronous>, transform_indices = @transform_3, window_bounds = array<i64: 8, 4>}]} {
    %c0_i32 = arith.constant 0 : i32
    %0 = arith.cmpi eq, %arg0, %c0_i32 : i32
    %1 = arith.extui %0 : i1 to i32
    %c0_i32_0 = arith.constant 0 : i32
    %2 = arith.cmpi ne, %1, %c0_i32_0 : i32
    scf.if %2 {
      %cst_25 = arith.constant 0.000000e+00 : f32
      %88 = vector.broadcast %cst_25 : f32 to vector<8x8xf32>
      %c0_26 = arith.constant 0 : index
      %c0_27 = arith.constant 0 : index
      %89 = vector.load %arg3[%c0_26, %c0_27] : memref<8x8xf32, #tpu.memory_space<vmem>>, vector<8x8xf32>
      tpu.vector_store %arg3[%c0_26, %c0_27], %88 {strides = array<i32>} : memref<8x8xf32, #tpu.memory_space<vmem>>, vector<8x8xf32>,
      %cst_28 = arith.constant 0.000000e+00 : f32
      %90 = vector.broadcast %cst_28 : f32 to vector<8x4xf32>
      %c0_29 = arith.constant 0 : index
      %c0_30 = arith.constant 0 : index
      %91 = vector.load %arg4[%c0_29, %c0_30] : memref<8x4xf32, #tpu.memory_space<vmem>>, vector<8x4xf32>
      tpu.vector_store %arg4[%c0_29, %c0_30], %90 {strides = array<i32>} : memref<8x4xf32, #tpu.memory_space<vmem>>, vector<8x4xf32>,
    } else {
    }
    %c0 = arith.constant 0 : index
    %c0_1 = arith.constant 0 : index
    %3 = vector.load %arg1[%c0, %c0_1] : memref<8x256xf32, #tpu.memory_space<vmem>>, vector<8x256xf32>
    %c0_2 = arith.constant 0 : index
    %c0_3 = arith.constant 0 : index
    %4 = vector.load %arg2[%c0_2, %c0_3] : memref<8x256xf32, #tpu.memory_space<vmem>>, vector<8x256xf32>
    %c0_4 = arith.constant 0 : index
    %c0_5 = arith.constant 0 : index
    %5 = vector.load %arg3[%c0_4, %c0_5] : memref<8x8xf32, #tpu.memory_space<vmem>>, vector<8x8xf32>
    %cst = arith.constant dense<0.000000e+00> : vector<8x8xf32>
    %6 = tpu.matmul %3, %3, %cst {dimension_numbers = #tpu.dot_dimension_numbers<[1], [1], [0], [0], [0, 0, 1, 0], [], []>} : vector<8x256xf32>, vector<8x256xf32>, vector<8x8xf32> -> vector<8x8xf32>
    %7 = arith.addf %5, %6 : vector<8x8xf32>
    %c0_6 = arith.constant 0 : index
    %c0_7 = arith.constant 0 : index
    %8 = vector.load %arg3[%c0_6, %c0_7] : memref<8x8xf32, #tpu.memory_space<vmem>>, vector<8x8xf32>
    tpu.vector_store %arg3[%c0_6, %c0_7], %7 {strides = array<i32>} : memref<8x8xf32, #tpu.memory_space<vmem>>, vector<8x8xf32>,
    %9 = tpu.iota {dimensions = array<i32: 0>} : vector<8x256xi32>
    %c2_i32 = arith.constant 2 : i32
    %c0_i32_8 = arith.constant 0 : i32
    %10 = arith.cmpi eq, %c2_i32, %c0_i32_8 : i32
    %c1_i32 = arith.constant 1 : i32
    %11 = arith.select %10, %c1_i32, %c2_i32 : i32
    %12 = vector.broadcast %11 : i32 to vector<8x256xi32>
    %13 = arith.remsi %9, %12 : vector<8x256xi32>
    %c0_i32_9 = arith.constant 0 : i32
    %14 = vector.broadcast %c0_i32_9 : i32 to vector<8x256xi32>
    %15 = arith.cmpi ne, %13, %14 : vector<8x256xi32>
    %c0_i32_10 = arith.constant 0 : i32
    %16 = vector.broadcast %c0_i32_10 : i32 to vector<8x256xi32>
    %17 = arith.cmpi slt, %13, %16 : vector<8x256xi32>
    %c0_i32_11 = arith.constant 0 : i32
    %18 = arith.cmpi slt, %11, %c0_i32_11 : i32
    %19 = vector.broadcast %18 : i1 to vector<8x256xi1>
    %20 = vector.broadcast %19 : vector<8x256xi1> to vector<8x256xi1>
    %21 = arith.xori %17, %20 : vector<8x256xi1>
    %22 = arith.andi %21, %15 : vector<8x256xi1>
    %23 = vector.broadcast %11 : i32 to vector<8x256xi32>
    %24 = arith.addi %13, %23 : vector<8x256xi32>
    %25 = arith.select %22, %24, %13 : vector<8x256xi1>, vector<8x256xi32>
    %c0_i32_12 = arith.constant 0 : i32
    %26 = vector.broadcast %c0_i32_12 : i32 to vector<8x256xi32>
    %27 = arith.cmpi eq, %25, %26 : vector<8x256xi32>
    %28 = vector.extract_strided_slice %4 {offsets = [0, 0], sizes = [1, 256], strides = [1, 1]} : vector<8x256xf32> to vector<1x256xf32>
    %29 = vector.shape_cast %28 : vector<1x256xf32> to vector<1x256xf32>
    %30 = vector.broadcast %29 : vector<1x256xf32> to vector<8x256xf32>
    %31 = vector.extract_strided_slice %4 {offsets = [1, 0], sizes = [1, 256], strides = [1, 1]} : vector<8x256xf32> to vector<1x256xf32>
    %32 = vector.shape_cast %31 : vector<1x256xf32> to vector<1x256xf32>
    %33 = vector.broadcast %32 : vector<1x256xf32> to vector<8x256xf32>
    %34 = arith.select %27, %30, %33 : vector<8x256xi1>, vector<8x256xf32>
    %35 = arith.subf %34, %4 : vector<8x256xf32>
    %36 = arith.mulf %35, %35 : vector<8x256xf32>
    %cst_13 = arith.constant 0.000000e+00 : f32
    %37 = vector.broadcast %cst_13 : f32 to vector<8x256xf32>
    %38 = arith.subf %37, %36 : vector<8x256xf32>
    %39 = math.exp %38 : vector<8x256xf32>
    %cst_14 = arith.constant dense<0.000000e+00> : vector<8xf32>
    %40 = vector.multi_reduction <add>, %39, %cst_14 [1] : vector<8x256xf32> to vector<8xf32>
    %41 = vector.shape_cast %40 : vector<8xf32> to vector<8x1xf32>
    %42 = vector.extract_strided_slice %4 {offsets = [2, 0], sizes = [1, 256], strides = [1, 1]} : vector<8x256xf32> to vector<1x256xf32>
    %43 = vector.shape_cast %42 : vector<1x256xf32> to vector<1x256xf32>
    %44 = vector.broadcast %43 : vector<1x256xf32> to vector<8x256xf32>
    %45 = vector.extract_strided_slice %4 {offsets = [3, 0], sizes = [1, 256], strides = [1, 1]} : vector<8x256xf32> to vector<1x256xf32>
    %46 = vector.shape_cast %45 : vector<1x256xf32> to vector<1x256xf32>
    %47 = vector.broadcast %46 : vector<1x256xf32> to vector<8x256xf32>
    %48 = arith.select %27, %44, %47 : vector<8x256xi1>, vector<8x256xf32>
    %49 = arith.subf %48, %4 : vector<8x256xf32>
    %50 = arith.mulf %49, %49 : vector<8x256xf32>
    %cst_15 = arith.constant 0.000000e+00 : f32
    %51 = vector.broadcast %cst_15 : f32 to vector<8x256xf32>
    %52 = arith.subf %51, %50 : vector<8x256xf32>
    %53 = math.exp %52 : vector<8x256xf32>
    %cst_16 = arith.constant dense<0.000000e+00> : vector<8xf32>
    %54 = vector.multi_reduction <add>, %53, %cst_16 [1] : vector<8x256xf32> to vector<8xf32>
    %55 = vector.shape_cast %54 : vector<8xf32> to vector<8x1xf32>
    %56 = vector.extract_strided_slice %4 {offsets = [4, 0], sizes = [1, 256], strides = [1, 1]} : vector<8x256xf32> to vector<1x256xf32>
    %57 = vector.shape_cast %56 : vector<1x256xf32> to vector<1x256xf32>
    %58 = vector.broadcast %57 : vector<1x256xf32> to vector<8x256xf32>
    %59 = vector.extract_strided_slice %4 {offsets = [5, 0], sizes = [1, 256], strides = [1, 1]} : vector<8x256xf32> to vector<1x256xf32>
    %60 = vector.shape_cast %59 : vector<1x256xf32> to vector<1x256xf32>
    %61 = vector.broadcast %60 : vector<1x256xf32> to vector<8x256xf32>
    %62 = arith.select %27, %58, %61 : vector<8x256xi1>, vector<8x256xf32>
    %63 = arith.subf %62, %4 : vector<8x256xf32>
    %64 = arith.mulf %63, %63 : vector<8x256xf32>
    %cst_17 = arith.constant 0.000000e+00 : f32
    %65 = vector.broadcast %cst_17 : f32 to vector<8x256xf32>
    %66 = arith.subf %65, %64 : vector<8x256xf32>
    %67 = math.exp %66 : vector<8x256xf32>
    %cst_18 = arith.constant dense<0.000000e+00> : vector<8xf32>
    %68 = vector.multi_reduction <add>, %67, %cst_18 [1] : vector<8x256xf32> to vector<8xf32>
    %69 = vector.shape_cast %68 : vector<8xf32> to vector<8x1xf32>
    %70 = vector.extract_strided_slice %4 {offsets = [6, 0], sizes = [1, 256], strides = [1, 1]} : vector<8x256xf32> to vector<1x256xf32>
    %71 = vector.shape_cast %70 : vector<1x256xf32> to vector<1x256xf32>
    %72 = vector.broadcast %71 : vector<1x256xf32> to vector<8x256xf32>
    %73 = vector.extract_strided_slice %4 {offsets = [7, 0], sizes = [1, 256], strides = [1, 1]} : vector<8x256xf32> to vector<1x256xf32>
    %74 = vector.shape_cast %73 : vector<1x256xf32> to vector<1x256xf32>
    %75 = vector.broadcast %74 : vector<1x256xf32> to vector<8x256xf32>
    %76 = arith.select %27, %72, %75 : vector<8x256xi1>, vector<8x256xf32>
    %77 = arith.subf %76, %4 : vector<8x256xf32>
    %78 = arith.mulf %77, %77 : vector<8x256xf32>
    %cst_19 = arith.constant 0.000000e+00 : f32
    %79 = vector.broadcast %cst_19 : f32 to vector<8x256xf32>
    %80 = arith.subf %79, %78 : vector<8x256xf32>
    %81 = math.exp %80 : vector<8x256xf32>
    %cst_20 = arith.constant dense<0.000000e+00> : vector<8xf32>
    %82 = vector.multi_reduction <add>, %81, %cst_20 [1] : vector<8x256xf32> to vector<8xf32>
    %83 = vector.shape_cast %82 : vector<8xf32> to vector<8x1xf32>
    %c0_21 = arith.constant 0 : index
    %c0_22 = arith.constant 0 : index
    %84 = vector.load %arg4[%c0_21, %c0_22] : memref<8x4xf32, #tpu.memory_space<vmem>>, vector<8x4xf32>
    %85 = tpu.concatenate %41, %55, %69, %83 in 1 : vector<8x1xf32>, vector<8x1xf32>, vector<8x1xf32>, vector<8x1xf32> -> vector<8x4xf32>
    %86 = arith.addf %84, %85 : vector<8x4xf32>
    %c0_23 = arith.constant 0 : index
    %c0_24 = arith.constant 0 : index
    %87 = vector.load %arg4[%c0_23, %c0_24] : memref<8x4xf32, #tpu.memory_space<vmem>>, vector<8x4xf32>
    tpu.vector_store %arg4[%c0_23, %c0_24], %86 {strides = array<i32>} : memref<8x4xf32, #tpu.memory_space<vmem>>, vector<8x4xf32>,
    return
  }
  func.func @transform_0(%arg0: i32) -> (i32, i32) {
    %c0_i32 = arith.constant 0 : i32
    %c0_i32_0 = arith.constant 0 : i32
    return %c0_i32, %arg0 : i32, i32
  }
  func.func @transform_1(%arg0: i32) -> (i32, i32) {
    %c0_i32 = arith.constant 0 : i32
    %c0_i32_0 = arith.constant 0 : i32
    return %c0_i32, %arg0 : i32, i32
  }
  func.func @transform_2(%arg0: i32) -> (i32, i32) {
    %c0_i32 = arith.constant 0 : i32
    %c0_i32_0 = arith.constant 0 : i32
    %c0_i32_1 = arith.constant 0 : i32
    return %c0_i32, %c0_i32_0 : i32, i32
  }
  func.func @transform_3(%arg0: i32) -> (i32, i32) {
    %c0_i32 = arith.constant 0 : i32
    %c0_i32_0 = arith.constant 0 : i32
    %c0_i32_1 = arith.constant 0 : i32
    return %c0_i32, %c0_i32_0 : i32, i32
  }
}

</mosaic_0001>

<bundles_post_ra>
// kernel: patch_manifold_loss.1
= control target key start
LH: loop header
LB: loop body
LE: loop exit
PB: predicated region body
PF: predicated region fallthrough
CT: control target
= control target key end

     0   :  { %v99_v0 = vlaneseq  ;;  %vm19_vm1 = vcmask 31744   ;;  %vm17_vm2 = vcmask 64512   ;;  %vm239_vm3 = vcmask 7168   ;;  %s376_s0 = inlined_call_operand.vmem [shape: f32[8,256], index: 0, kind: input, shape index: {}]   ;;  %s377_s1 = inlined_call_operand.vmem [shape: f32[8,256], index: 1, kind: input, shape index: {}]   ;;  %s378_s3 = inlined_call_operand.vmem [shape: f32[8,4], index: 3, kind: output, shape index: {1}]   ;;  %s379_s2 = inlined_call_operand.vmem [shape: f32[8,8], index: 2, kind: output, shape index: {0}]  }
   0x1   :  { %v22_v1 = vld [vmem:[%s376_s0 + $0x8] sm:$0xff]  ;;  %v21_v2 = vld [vmem:[%s376_s0] sm:$0xff]  ;;  %vm241_vm4 = vcmask 15360   ;;  %vm243_vm5 = vcmask 23552  }
   0x2   :  { %26 = vmatprep.subr.mxu0 %v22_v1  ;;  %90 = vmatprep.mubr.f32.mxu0 %v22_v1  ;;  %v100_v3 = vshrl.u32 %v99_v0, 7  ;;  %v303_v4 = vld [vmem:[%s377_s1] sm:$0xff]  ;;  %v308_v5 = vld [vmem:[%s377_s1 + $0x8] sm:$0xff] }
   0x3   :  { %27 = vmatpush1.xpose.msra.mxu0 %v21_v2 }
   0x4   :  { %v105_v6 = vand.u32 1, %v100_v3  ;;  %v116_v7 = vsub.s32 0, %v100_v3  ;;  %v124_v8 = vsub.s32 1, %v100_v3  ;;  %v178_v9 = vsub.s32 4, %v100_v3 }
   0x5   :  { %v186_v10 = vsub.s32 5, %v100_v3  ;;  %v147_v11 = vsub.s32 2, %v100_v3  ;;  %v155_v12 = vsub.s32 3, %v100_v3  ;;  %v209_v13 = vsub.s32 6, %v100_v3 }
   0x6   :  { %91 = vmatmul.mubr.f32.vlgmr.msra.gmra.mrb[0].mxu0 %v21_v2  ;;  %vm310_vm0 = vcmp.eq.s32.totalorder %v105_v6, 0  ;;  %v117_v15 = vrot.slane %v303_v4, %v116_v7  ;;  %v121_v16 = vrot.slane %v308_v5, %v116_v7  ;;  %v125_v17 = vrot.slane %v303_v4, %v124_v8 }
   0x7   :  { %v129_v18 = vrot.slane %v308_v5, %v124_v8  ;;  %v179_v19 = vrot.slane %v303_v4, %v178_v9  ;;  %v183_v20 = vrot.slane %v308_v5, %v178_v9  ;;  %v187_v21 = vrot.slane %v303_v4, %v186_v10 }
   0x8   :  { %v130_v22 = vsel %vm310_vm0, %v117_v15, %v125_v17  ;;  %v191_v23 = vrot.slane %v308_v5, %v186_v10  ;;  %v148_v24 = vrot.slane %v303_v4, %v147_v11  ;;  %v152_v25 = vrot.slane %v308_v5, %v147_v11 }
   0x9   :  { %v131_v26 = vsel %vm310_vm0, %v121_v16, %v129_v18  ;;  %v132_v27 = vsub.f32 %v130_v22, %v303_v4  ;;  %v192_v28 = vsel %vm310_vm0, %v179_v19, %v187_v21  ;;  %v156_v29 = vrot.slane %v303_v4, %v155_v12 }
   0xa   :  { %v133_v30 = vsub.f32 %v131_v26, %v308_v5  ;;  %v193_v31 = vsel %vm310_vm0, %v183_v20, %v191_v23  ;;  %v194_v32 = vsub.f32 %v192_v28, %v303_v4  ;;  %v160_v33 = vrot.slane %v308_v5, %v155_v12 }
   0xb   :  { %v134_v34 = vmul.f32 %v132_v27, %v132_v27  ;;  %v195_v35 = vsub.f32 %v193_v31, %v308_v5  ;;  %v161_v36 = vsel %vm310_vm0, %v148_v24, %v156_v29  ;;  %v210_v44 = vrot.slane %v303_v4, %v209_v13 }
   0xc   :  { %v135_v37 = vmul.f32 %v133_v30, %v133_v30  ;;  %v196_v38 = vmul.f32 %v194_v32, %v194_v32  ;;  %v162_v39 = vsel %vm310_vm0, %v152_v25, %v160_v33  ;;  %v163_v40 = vsub.f32 %v161_v36, %v303_v4 }
   0xd   :  { %v136_v41 = vsub.f32 0.0, %v134_v34  ;;  %v197_v42 = vmul.f32 %v195_v35, %v195_v35  ;;  %v164_v43 = vsub.f32 %v162_v39, %v308_v5  ;;  %v217_v48 = vsub.s32 7, %v100_v3 }
   0xe   :  { %v137_v45 = vsub.f32 0.0, %v135_v37  ;;  %v198_v46 = vsub.f32 0.0, %v196_v38  ;;  %v165_v47 = vmul.f32 %v163_v40, %v163_v40  ;;  %v214_v52 = vrot.slane %v308_v5, %v209_v13 }
   0xf   :  { %v138_v49 = vmul.f32 1.442695, %v136_v41  ;;  %v199_v50 = vsub.f32 0.0, %v197_v42  ;;  %v166_v51 = vmul.f32 %v164_v43, %v164_v43  ;;  %v218_v56 = vrot.slane %v303_v4, %v217_v48 }
  0x10   :  { %v140_v53 = vmul.f32 1.442695, %v137_v45  ;;  %v200_v54 = vmul.f32 1.442695, %v198_v46  ;;  %v167_v55 = vsub.f32 0.0, %v165_v47  ;;  %v222_v59 = vrot.slane %v308_v5, %v217_v48 }
  0x11   :  { %257 = vpow2.f32 %v138_v49  ;;  %v202_v57 = vmul.f32 1.442695, %v199_v50  ;;  %v168_v58 = vsub.f32 0.0, %v166_v51  ;;  %v223_v61 = vsel %vm310_vm0, %v210_v44, %v218_v56 }
  0x12   :  { %259 = vpow2.f32 %v140_v53  ;;  %v169_v60 = vmul.f32 1.442695, %v167_v55  ;;  %v224_v63 = vsel %vm310_vm0, %v214_v52, %v222_v59  ;;  %v225_v0 = vsub.f32 %v223_v61, %v303_v4 }
  0x13   :  { %261 = vpow2.f32 %v200_v54  ;;  %v171_v62 = vmul.f32 1.442695, %v168_v58  ;;  %v226_v1 = vsub.f32 %v224_v63, %v308_v5  ;;  %v273_v20 = vmov 0.0  }
  0x14   :  { %263 = vpow2.f32 %v202_v57  ;;  %v227_v2 = vmul.f32 %v225_v0, %v225_v0  ;;  %20 = vst.msk [vmem:[%s378_s3] sm:$0xff] %vm19_vm1, %v273_v20 }
  0x15   :  { %265 = vpow2.f32 %v169_v60  ;;  %v228_v3 = vmul.f32 %v226_v1, %v226_v1  ;;  %18 = vst.msk [vmem:[%s379_s2] sm:$0xff] %vm17_vm2, %v273_v20 }
  0x16   :  { %267 = vpow2.f32 %v171_v62  ;;  %v229_v6 = vsub.f32 0.0, %v227_v2 }
  0x17   :  { %v230_v7 = vsub.f32 0.0, %v228_v3 }
  0x18   :  { %v231_v8 = vmul.f32 1.442695, %v229_v6 }
  0x19   :  { %v233_v9 = vmul.f32 1.442695, %v230_v7 }
  0x1a   :  { %269 = vpow2.f32 %v231_v8 }
  0x1b   :  { %v258_v10 = vpop.eup %257  ;;  %271 = vpow2.f32 %v233_v9  ;;  %v238_v26 = vld [vmem:[%s378_s3] sm:$0xff] }
  0x1c   :  { %v260_v11 = vpop.eup %259  ;;  %v25_v30 = vld [vmem:[%s379_s2] sm:$0xff] }
  0x1d   :  { %v262_v12 = vpop.eup %261  ;;  %v142_v13 = vadd.f32 %v260_v11, %v258_v10 }
  0x1e   :  { %v264_v14 = vpop.eup %263 }
  0x1f   :  { %v266_v15 = vpop.eup %265  ;;  %143 = vadd.xlane.f32.xlu0 %v142_v13  ;;  %v204_v4 = vadd.f32 %v264_v14, %v262_v12 }
  0x20   :  { %v268_v16 = vpop.eup %267 }
  0x21   :  { %205 = vadd.xlane.f32.xlu1 %v204_v4  ;;  %v173_v5 = vadd.f32 %v268_v16, %v266_v15 }
  0x23   :  { %174 = vadd.xlane.f32.xlu0 %v173_v5 }
  0x24   :  { %v270_v17 = vpop.eup %269 }
  0x25   :  { %v272_v18 = vpop.eup %271 }
  0x26   :  { %v235_v19 = vadd.f32 %v272_v18, %v270_v17 }
  0x28   :  { %236 = vadd.xlane.f32.xlu1 %v235_v19 }
  0xac   :  { %v144_v21 = vpop.xlane.xlu0 %143 }
  0xae   :  { %v206_v22 = vpop.xlane.xlu1 %205 }
  0xb0   :  { %v175_v23 = vpop.xlane.xlu0 %174 }
  0xb1   :  { %v240_v24 = vsel %vm239_vm3, %v144_v21, %v175_v23 }
  0xb2   :  { %v242_v25 = vsel %vm241_vm4, %v240_v24, %v206_v22 }
  0xb5   :  { %v237_v27 = vpop.xlane.xlu1 %236 }
  0xb6   :  { %v244_v28 = vsel %vm243_vm5, %v242_v25, %v237_v27 }
  0xb7   :  { %v245_v29 = vadd.f32 %v244_v28, %v238_v26 }
  0xb9   :  { %247 = vst.msk [vmem:[%s378_s3] sm:$0xff] %vm19_vm1, %v245_v29 }
  0xd9   :  { %v92_v31 = vpop.f32.mrb[0].mxu0 }
  0xda   :  { %v96_v32 = vadd.f32 %v92_v31, %v25_v30  ;;  %v94_v33 = vpop.f32.mrb[1].mxu0 }
  0xdc   :  { %98 = vst.msk [vmem:[%s379_s2] sm:$0xff] %vm17_vm2, %v96_v32 }

</bundles_post_ra>
